<compile_context>
chip_gen: v7x
topology: tpu7x:2x2x1
jax: 0.10.0
libtpu: 0.0.40
codegen_flags: <defaults>
</compile_context>

<pallas_src>
import functools

import numpy as np
import jax
import jax.numpy as jnp
from jax import lax
from jax.experimental import pallas as pl
from jax.experimental.pallas import tpu as pltpu

_LANES = 128


def _cdiv(a, b):
    return (a + b - 1) // b


def _dice_partials_kernel(logits_ref, tgt_ref, out_ref, acc_ref, *,
                          num_classes, tile_rows, chunk_rows, num_chunks,
                          tiles_per_shard, n_valid, any_mask, approx_recip):
    """Per-(batch, shard) partial sums: intersection, sum(probs), sum(one_hot).

    logits_ref: (1, C, tile_rows, 128)   tgt_ref: (1, 1, tile_rows, 128) int32
    out_ref:    (1, 1, 3, C)             acc_ref: (3, C, chunk_rows, 128) f32
    """
    C = num_classes
    t = pl.program_id(2)

    @pl.when(t == 0)
    def _init():
        acc_ref[...] = jnp.zeros_like(acc_ref)

    # Un-clamped tile index (clamped tiles re-read data but mask to zero).
    tile_idx = pl.program_id(1) * tiles_per_shard + t

    def accumulate(masked):
        row_base = tile_idx * tile_rows

        def body(i, carry):
            r0 = pl.multiple_of(i * chunk_rows, chunk_rows)
            # C-way elementwise softmax over full [chunk_rows, 128] slabs.
            xs = [logits_ref[0, c, pl.ds(r0, chunk_rows), :].astype(jnp.float32)
                  for c in range(C)]
            m = xs[0]
            for c in range(1, C):
                m = jnp.maximum(m, xs[c])
            es = [jnp.exp(xs[c] - m) for c in range(C)]
            den = es[0]
            for c in range(1, C):
                den = den + es[c]
            inv = pl.reciprocal(den, approx=approx_recip)

            tgt = tgt_ref[0, 0, pl.ds(r0, chunk_rows), :]

            if masked:
                rows = lax.broadcasted_iota(jnp.int32, (chunk_rows, _LANES), 0)
                lanes = lax.broadcasted_iota(jnp.int32, (chunk_rows, _LANES), 1)
                valid = (row_base + r0 + rows) * _LANES + lanes < n_valid

            new = list(carry)
            for c in range(C):
                p_c = es[c] * inv
                hot = tgt == c
                if masked:
                    hot = jnp.logical_and(hot, valid)
                    p_sum = jnp.where(valid, p_c, 0.0)
                else:
                    p_sum = p_c
                new[c] = carry[c] + jnp.where(hot, p_c, 0.0)              # intersect
                new[C + c] = carry[C + c] + p_sum                          # sum probs
                new[2 * C + c] = carry[2 * C + c] + hot.astype(jnp.float32)  # one-hot
            return tuple(new)

        zeros = jnp.zeros((chunk_rows, _LANES), jnp.float32)
        carry = lax.fori_loop(0, num_chunks, body, (zeros,) * (3 * C))
        # Fold vreg carries into the persistent scratch once per tile.
        for c in range(C):
            acc_ref[0, c] += carry[c]
            acc_ref[1, c] += carry[C + c]
            acc_ref[2, c] += carry[2 * C + c]

    if any_mask:
        # Only tiles whose covered element range spills past the real volume
        # (the ragged tail and clamped shard-overflow tiles) pay for masking.
        covered_end = (tile_idx * tile_rows + num_chunks * chunk_rows) * _LANES
        needs_mask = covered_end > n_valid

        @pl.when(jnp.logical_not(needs_mask))
        def _fast():
            accumulate(False)

        @pl.when(needs_mask)
        def _tail():
            accumulate(True)
    else:
        accumulate(False)

    @pl.when(t == pl.num_programs(2) - 1)
    def _store():
        tot = jnp.sum(acc_ref[...], axis=-1)      # (3, C, chunk_rows)
        out_ref[0, 0] = jnp.sum(tot, axis=-1)     # (3, C), single writeback


def _default_num_shards(batch):
    """Spatial shards so batch * shards can feed every TensorCore on the chip."""
    cores = 1
    try:
        dev = jax.devices()[0]
        for attr in ("num_cores", "core_count", "num_cores_per_chip"):
            val = getattr(dev, attr, None)
            if isinstance(val, int) and val > 0:
                cores = val
                break
    except Exception:
        pass
    return 1 if batch >= cores else cores


def log_cosh_dice_loss(logits, target, smooth=1e-6, *,
                       tile_bytes=2 * 1024 * 1024, chunk_rows=8,
                       num_spatial_shards=None, approx_reciprocal=True):
    """Pallas TPU implementation of LogCoshDiceLoss.forward (apply_nonlin=None).

    logits: [B, C, *spatial] float; target: [B, *spatial] or [B, 1, *spatial] int.
    approx_reciprocal=True uses the EUP approximate reciprocal for the softmax
    normalization (~1e-4 relative error on probs); set False for exact divides
    (e.g. validation runs).
    """
    # TODO(synk): loss_mask path of the PyTorch module is not implemented.
    if target.ndim == logits.ndim and target.shape[1] == 1:
        target = jnp.squeeze(target, axis=1)
    assert chunk_rows % 8 == 0, "chunk_rows must be a multiple of 8 sublanes"

    B, C = logits.shape[:2]
    N = int(np.prod(logits.shape[2:]))
    itemsize = jnp.dtype(logits.dtype).itemsize

    # Rows-per-tile target so each grid step moves ~tile_bytes of logits.
    tr_target = max(chunk_rows,
                    (tile_bytes // (C * _LANES * itemsize)) // chunk_rows * chunk_rows)

    rows = _cdiv(N, _LANES)
    if rows <= tr_target and rows % chunk_rows != 0:
        rows = _cdiv(rows, chunk_rows) * chunk_rows   # single full-dim block case
    n_pad = rows * _LANES

    logits_flat = logits.reshape(B, C, N)
    target_flat = target.reshape(B, N).astype(jnp.int32)
    if n_pad != N:
        # Pad-copy only for ragged volumes; padded voxels are masked in-kernel.
        logits_flat = jnp.pad(logits_flat, ((0, 0), (0, 0), (0, n_pad - N)))
        target_flat = jnp.pad(target_flat, ((0, 0), (0, n_pad - N)))
    logits4 = logits_flat.reshape(B, C, rows, _LANES)    # zero-copy split of N
    target4 = target_flat.reshape(B, 1, rows, _LANES)

    tile_rows = rows if rows <= tr_target else tr_target
    tiles_total = _cdiv(rows, tile_rows)
    num_chunks = _cdiv(tile_rows, chunk_rows)

    if num_spatial_shards is None:
        num_spatial_shards = _default_num_shards(B)
    n_shards = max(1, min(num_spatial_shards, tiles_total))
    tps = _cdiv(tiles_total, n_shards)                   # tiles per shard

    any_mask = (n_pad != N
                or tiles_total * tile_rows != rows
                or n_shards * tps != tiles_total
                or num_chunks * chunk_rows != tile_rows)

    last_tile = tiles_total - 1

    def in_map(b, s, t):
        # Clamp so shard-overflow tiles re-read the last real tile; their
        # contribution is zeroed by the in-kernel validity mask.
        return (b, 0, jnp.minimum(s * tps + t, last_tile), 0)

    def out_map(b, s, t):
        return (b, s, 0, 0)

    kernel = functools.partial(
        _dice_partials_kernel,
        num_classes=C, tile_rows=tile_rows, chunk_rows=chunk_rows,
        num_chunks=num_chunks, tiles_per_shard=tps, n_valid=N,
        any_mask=any_mask, approx_recip=approx_reciprocal)

    block_bytes = (C * itemsize + 4) * tile_rows * _LANES
    vmem_limit = int(min(48 * 1024 * 1024, max(24 * 1024 * 1024, 4 * block_bytes)))

    partials = pl.pallas_call(
        kernel,
        out_shape=jax.ShapeDtypeStruct((B, n_shards, 3, C), jnp.float32),
        grid_spec=pltpu.PrefetchScalarGridSpec(
            num_scalar_prefetch=0,
            grid=(B, n_shards, tps),
            in_specs=[
                pl.BlockSpec((1, C, tile_rows, _LANES), in_map),
                pl.BlockSpec((1, 1, tile_rows, _LANES), in_map),
            ],
            out_specs=pl.BlockSpec((1, 1, 3, C), out_map),
            scratch_shapes=[pltpu.VMEM((3, C, chunk_rows, _LANES), jnp.float32)],
        ),
        compiler_params=pltpu.CompilerParams(
            dimension_semantics=("parallel", "parallel", "arbitrary"),
            vmem_limit_bytes=vmem_limit),
    )(logits4, target4)

    sums = jnp.sum(partials, axis=1)                      # [B, 3, C]
    intersection = sums[:, 0, :]
    union = sums[:, 1, :] + sums[:, 2, :]
    dice = (2.0 * intersection + smooth) / (union + smooth)
    dice_loss = 1.0 - dice
    log_cosh = jnp.log((jnp.exp(dice_loss) + jnp.exp(-dice_loss)) / 2.0)
    return jnp.mean(log_cosh)


def _reference_loss(logits, target, smooth=1e-6):
    """Pure-JAX reference mirroring the PyTorch forward (loss_mask=None)."""
    if target.ndim == logits.ndim and target.shape[1] == 1:
        target = jnp.squeeze(target, axis=1)
    B, C = logits.shape[:2]
    probs = jax.nn.softmax(logits.astype(jnp.float32), axis=1)
    probs_flat = probs.reshape(B, C, -1)
    target_flat = target.reshape(B, -1).astype(jnp.int32)
    one_hot = jax.nn.one_hot(target_flat, C, axis=1, dtype=jnp.float32)
    intersection = jnp.sum(probs_flat * one_hot, axis=2)
    union = jnp.sum(probs_flat, axis=2) + jnp.sum(one_hot, axis=2)
    dice = (2.0 * intersection + smooth) / (union + smooth)
    dice_loss = 1.0 - dice
    log_cosh = jnp.log((jnp.exp(dice_loss) + jnp.exp(-dice_loss)) / 2.0)
    return jnp.mean(log_cosh)


if __name__ == "__main__":
    key = jax.random.PRNGKey(0)
    k1, k2, k3, k4 = jax.random.split(key, 4)

    # Test 1: N a multiple of 128*chunk_rows -> pure fast path, single tile.
    B, C, D, H, W = 2, 4, 8, 16, 16          # N = 2048
    logits = jax.random.normal(k1, (B, C, D, H, W), dtype=jnp.float32)
    target = jax.random.randint(k2, (B, D, H, W), 0, C, dtype=jnp.int32)
    loss = jax.block_until_ready(log_cosh_dice_loss(logits, target))
    ref = jax.block_until_ready(_reference_loss(logits, target))
    np.testing.assert_allclose(np.asarray(loss), np.asarray(ref),
                               rtol=5e-3, atol=2e-3)

    # Test 2: ragged N, [B,1,...] target, forced small tiles + 2 spatial
    # shards -> exercises multi-tile grid, the partial last block, the gated
    # masked tail path, clamped shard tiles and the shard-partial epilogue sum.
    B2, C2, D2, H2, W2 = 1, 3, 5, 9, 40      # N = 1800
    logits2 = jax.random.normal(k3, (B2, C2, D2, H2, W2), dtype=jnp.float32)
    target2 = jax.random.randint(k4, (B2, 1, D2, H2, W2), 0, C2,
                                 dtype=jnp.int32)
    loss2 = jax.block_until_ready(
        log_cosh_dice_loss(logits2, target2,
                           tile_bytes=8 * _LANES * C2 * 4,   # force 8-row tiles
                           num_spatial_shards=2))
    ref2 = jax.block_until_ready(_reference_loss(logits2, target2))
    np.testing.assert_allclose(np.asarray(loss2), np.asarray(ref2),
                               rtol=5e-3, atol=2e-3)

    print("KERNEL_OK")
</pallas_src>

<mosaic_0001>
module attributes {stable_mosaic.version = 11 : i64} {
  func.func @_dice_partials_kernel(%arg0: i32, %arg1: i32, %arg2: i32, %arg3: memref<1x4x16x128xf32, #tpu.memory_space<vmem>>, %arg4: memref<1x1x16x128xi32, #tpu.memory_space<vmem>>, %arg5: memref<1x1x3x4xf32, #tpu.memory_space<vmem>>, %arg6: memref<3x4x8x128xf32, #tpu.memory_space<vmem>>) attributes {dimension_semantics = [#tpu.dimension_semantics<parallel>, #tpu.dimension_semantics<parallel>, #tpu.dimension_semantics<arbitrary>], iteration_bounds = array<i64: 2, 1, 1>, scalar_prefetch = 0 : i64, scratch_operands = 1 : i64, tpu.core_type = #tpu.core_type<tc>, window_params = [{transform_indices = @transform_0, window_bounds = array<i64: 1, 4, 16, 128>}, {transform_indices = @transform_1, window_bounds = array<i64: 1, 1, 16, 128>}, {transform_indices = @transform_2, window_bounds = array<i64: 1, 1, 3, 4>}]} {
    %c0_i32 = arith.constant 0 : i32
    %0 = arith.cmpi eq, %arg2, %c0_i32 : i32
    %1 = arith.extui %0 : i1 to i32
    %c0_i32_0 = arith.constant 0 : i32
    %2 = arith.cmpi ne, %1, %c0_i32_0 : i32
    scf.if %2 {
      %cst_97 = arith.constant 0.000000e+00 : f32
      %81 = vector.broadcast %cst_97 : f32 to vector<3x4x8x128xf32>
      %c0_98 = arith.constant 0 : index
      %c0_99 = arith.constant 0 : index
      %c0_100 = arith.constant 0 : index
      %c0_101 = arith.constant 0 : index
      %82 = vector.load %arg6[%c0_98, %c0_99, %c0_100, %c0_101] : memref<3x4x8x128xf32, #tpu.memory_space<vmem>>, vector<3x4x8x128xf32>
      tpu.vector_store %arg6[%c0_98, %c0_99, %c0_100, %c0_101], %81 {strides = array<i32>} : memref<3x4x8x128xf32, #tpu.memory_space<vmem>>, vector<3x4x8x128xf32>,
    } else {
    }
    %cst = arith.constant 0.000000e+00 : f32
    %3 = vector.broadcast %cst : f32 to vector<8x128xf32>
    %c0_i32_1 = arith.constant 0 : i32
    %c2_i32 = arith.constant 2 : i32
    %4 = arith.addi %c0_i32_1, %c2_i32 : i32
    %c1_i32 = arith.constant 1 : i32
    %5:12 = scf.for %arg7 = %c0_i32_1 to %4 step %c1_i32 iter_args(%arg8 = %3, %arg9 = %3, %arg10 = %3, %arg11 = %3, %arg12 = %3, %arg13 = %3, %arg14 = %3, %arg15 = %3, %arg16 = %3, %arg17 = %3, %arg18 = %3, %arg19 = %3) -> (vector<8x128xf32>, vector<8x128xf32>, vector<8x128xf32>, vector<8x128xf32>, vector<8x128xf32>, vector<8x128xf32>, vector<8x128xf32>, vector<8x128xf32>, vector<8x128xf32>, vector<8x128xf32>, vector<8x128xf32>, vector<8x128xf32>)  : i32 {
      %c8_i32 = arith.constant 8 : i32
      %81 = arith.muli %arg7, %c8_i32 : i32
      %82 = tpu.assume_multiple %81, 8 : i32
      %c0_97 = arith.constant 0 : index
      %c0_98 = arith.constant 0 : index
      %83 = arith.index_cast %82 : i32 to index
      %c0_99 = arith.constant 0 : index
      %84 = vector.load %arg3[%c0_97, %c0_98, %83, %c0_99] : memref<1x4x16x128xf32, #tpu.memory_space<vmem>>, vector<1x1x8x128xf32>
      %85 = vector.shape_cast %84 : vector<1x1x8x128xf32> to vector<8x128xf32>
      %c0_100 = arith.constant 0 : index
      %c1_101 = arith.constant 1 : index
      %86 = arith.index_cast %82 : i32 to index
      %c0_102 = arith.constant 0 : index
      %87 = vector.load %arg3[%c0_100, %c1_101, %86, %c0_102] : memref<1x4x16x128xf32, #tpu.memory_space<vmem>>, vector<1x1x8x128xf32>
      %88 = vector.shape_cast %87 : vector<1x1x8x128xf32> to vector<8x128xf32>
      %c0_103 = arith.constant 0 : index
      %c2_104 = arith.constant 2 : index
      %89 = arith.index_cast %82 : i32 to index
      %c0_105 = arith.constant 0 : index
      %90 = vector.load %arg3[%c0_103, %c2_104, %89, %c0_105] : memref<1x4x16x128xf32, #tpu.memory_space<vmem>>, vector<1x1x8x128xf32>
      %91 = vector.shape_cast %90 : vector<1x1x8x128xf32> to vector<8x128xf32>
      %c0_106 = arith.constant 0 : index
      %c3_107 = arith.constant 3 : index
      %92 = arith.index_cast %82 : i32 to index
      %c0_108 = arith.constant 0 : index
      %93 = vector.load %arg3[%c0_106, %c3_107, %92, %c0_108] : memref<1x4x16x128xf32, #tpu.memory_space<vmem>>, vector<1x1x8x128xf32>
      %94 = vector.shape_cast %93 : vector<1x1x8x128xf32> to vector<8x128xf32>
      %95 = arith.maximumf %85, %88 : vector<8x128xf32>
      %96 = arith.maximumf %95, %91 : vector<8x128xf32>
      %97 = arith.maximumf %96, %94 : vector<8x128xf32>
      %98 = arith.subf %85, %97 : vector<8x128xf32>
      %99 = math.exp %98 : vector<8x128xf32>
      %100 = arith.subf %88, %97 : vector<8x128xf32>
      %101 = math.exp %100 : vector<8x128xf32>
      %102 = arith.subf %91, %97 : vector<8x128xf32>
      %103 = math.exp %102 : vector<8x128xf32>
      %104 = arith.subf %94, %97 : vector<8x128xf32>
      %105 = math.exp %104 : vector<8x128xf32>
      %106 = arith.addf %99, %101 : vector<8x128xf32>
      %107 = arith.addf %106, %103 : vector<8x128xf32>
      %108 = arith.addf %107, %105 : vector<8x128xf32>
      %109 = tpu.reciprocal %108 {approx = true} : vector<8x128xf32> -> vector<8x128xf32>
      %c0_109 = arith.constant 0 : index
      %c0_110 = arith.constant 0 : index
      %110 = arith.index_cast %82 : i32 to index
      %c0_111 = arith.constant 0 : index
      %111 = vector.load %arg4[%c0_109, %c0_110, %110, %c0_111] : memref<1x1x16x128xi32, #tpu.memory_space<vmem>>, vector<1x1x8x128xi32>
      %112 = vector.shape_cast %111 : vector<1x1x8x128xi32> to vector<8x128xi32>
      %113 = arith.mulf %99, %109 : vector<8x128xf32>
      %c0_i32_112 = arith.constant 0 : i32
      %114 = vector.broadcast %c0_i32_112 : i32 to vector<8x128xi32>
      %115 = arith.cmpi eq, %112, %114 : vector<8x128xi32>
      %cst_113 = arith.constant 0.000000e+00 : f32
      %116 = vector.broadcast %cst_113 : f32 to vector<8x128xf32>
      %117 = arith.select %115, %113, %116 : vector<8x128xi1>, vector<8x128xf32>
      %118 = arith.addf %arg8, %117 : vector<8x128xf32>
      %119 = arith.addf %arg12, %113 : vector<8x128xf32>
      %120 = arith.extui %115 : vector<8x128xi1> to vector<8x128xi32>
      %121 = arith.sitofp %120 : vector<8x128xi32> to vector<8x128xf32>
      %122 = arith.addf %arg16, %121 : vector<8x128xf32>
      %123 = arith.mulf %101, %109 : vector<8x128xf32>
      %c1_i32_114 = arith.constant 1 : i32
      %124 = vector.broadcast %c1_i32_114 : i32 to vector<8x128xi32>
      %125 = arith.cmpi eq, %112, %124 : vector<8x128xi32>
      %cst_115 = arith.constant 0.000000e+00 : f32
      %126 = vector.broadcast %cst_115 : f32 to vector<8x128xf32>
      %127 = arith.select %125, %123, %126 : vector<8x128xi1>, vector<8x128xf32>
      %128 = arith.addf %arg9, %127 : vector<8x128xf32>
      %129 = arith.addf %arg13, %123 : vector<8x128xf32>
      %130 = arith.extui %125 : vector<8x128xi1> to vector<8x128xi32>
      %131 = arith.sitofp %130 : vector<8x128xi32> to vector<8x128xf32>
      %132 = arith.addf %arg17, %131 : vector<8x128xf32>
      %133 = arith.mulf %103, %109 : vector<8x128xf32>
      %c2_i32_116 = arith.constant 2 : i32
      %134 = vector.broadcast %c2_i32_116 : i32 to vector<8x128xi32>
      %135 = arith.cmpi eq, %112, %134 : vector<8x128xi32>
      %cst_117 = arith.constant 0.000000e+00 : f32
      %136 = vector.broadcast %cst_117 : f32 to vector<8x128xf32>
      %137 = arith.select %135, %133, %136 : vector<8x128xi1>, vector<8x128xf32>
      %138 = arith.addf %arg10, %137 : vector<8x128xf32>
      %139 = arith.addf %arg14, %133 : vector<8x128xf32>
      %140 = arith.extui %135 : vector<8x128xi1> to vector<8x128xi32>
      %141 = arith.sitofp %140 : vector<8x128xi32> to vector<8x128xf32>
      %142 = arith.addf %arg18, %141 : vector<8x128xf32>
      %143 = arith.mulf %105, %109 : vector<8x128xf32>
      %c3_i32 = arith.constant 3 : i32
      %144 = vector.broadcast %c3_i32 : i32 to vector<8x128xi32>
      %145 = arith.cmpi eq, %112, %144 : vector<8x128xi32>
      %cst_118 = arith.constant 0.000000e+00 : f32
      %146 = vector.broadcast %cst_118 : f32 to vector<8x128xf32>
      %147 = arith.select %145, %143, %146 : vector<8x128xi1>, vector<8x128xf32>
      %148 = arith.addf %arg11, %147 : vector<8x128xf32>
      %149 = arith.addf %arg15, %143 : vector<8x128xf32>
      %150 = arith.extui %145 : vector<8x128xi1> to vector<8x128xi32>
      %151 = arith.sitofp %150 : vector<8x128xi32> to vector<8x128xf32>
      %152 = arith.addf %arg19, %151 : vector<8x128xf32>
      scf.yield %118, %128, %138, %148, %119, %129, %139, %149, %122, %132, %142, %152 : vector<8x128xf32>, vector<8x128xf32>, vector<8x128xf32>, vector<8x128xf32>, vector<8x128xf32>, vector<8x128xf32>, vector<8x128xf32>, vector<8x128xf32>, vector<8x128xf32>, vector<8x128xf32>, vector<8x128xf32>, vector<8x128xf32>
    }
    %c2_i32_2 = arith.constant 2 : i32
    %c0 = arith.constant 0 : index
    %c0_3 = arith.constant 0 : index
    %c0_4 = arith.constant 0 : index
    %c0_5 = arith.constant 0 : index
    %6 = vector.load %arg6[%c0, %c0_3, %c0_4, %c0_5] : memref<3x4x8x128xf32, #tpu.memory_space<vmem>>, vector<1x1x8x128xf32>
    %7 = vector.shape_cast %6 : vector<1x1x8x128xf32> to vector<8x128xf32>
    %8 = arith.addf %7, %5#0 : vector<8x128xf32>
    %c0_6 = arith.constant 0 : index
    %c0_7 = arith.constant 0 : index
    %c0_8 = arith.constant 0 : index
    %c0_9 = arith.constant 0 : index
    %9 = vector.load %arg6[%c0_6, %c0_7, %c0_8, %c0_9] : memref<3x4x8x128xf32, #tpu.memory_space<vmem>>, vector<1x1x8x128xf32>
    %10 = vector.shape_cast %9 : vector<1x1x8x128xf32> to vector<8x128xf32>
    %11 = vector.shape_cast %8 : vector<8x128xf32> to vector<1x1x8x128xf32>
    tpu.vector_store %arg6[%c0_6, %c0_7, %c0_8, %c0_9], %11 {strides = array<i32>} : memref<3x4x8x128xf32, #tpu.memory_space<vmem>>, vector<1x1x8x128xf32>,
    %c1 = arith.constant 1 : index
    %c0_10 = arith.constant 0 : index
    %c0_11 = arith.constant 0 : index
    %c0_12 = arith.constant 0 : index
    %12 = vector.load %arg6[%c1, %c0_10, %c0_11, %c0_12] : memref<3x4x8x128xf32, #tpu.memory_space<vmem>>, vector<1x1x8x128xf32>
    %13 = vector.shape_cast %12 : vector<1x1x8x128xf32> to vector<8x128xf32>
    %14 = arith.addf %13, %5#4 : vector<8x128xf32>
    %c1_13 = arith.constant 1 : index
    %c0_14 = arith.constant 0 : index
    %c0_15 = arith.constant 0 : index
    %c0_16 = arith.constant 0 : index
    %15 = vector.load %arg6[%c1_13, %c0_14, %c0_15, %c0_16] : memref<3x4x8x128xf32, #tpu.memory_space<vmem>>, vector<1x1x8x128xf32>
    %16 = vector.shape_cast %15 : vector<1x1x8x128xf32> to vector<8x128xf32>
    %17 = vector.shape_cast %14 : vector<8x128xf32> to vector<1x1x8x128xf32>
    tpu.vector_store %arg6[%c1_13, %c0_14, %c0_15, %c0_16], %17 {strides = array<i32>} : memref<3x4x8x128xf32, #tpu.memory_space<vmem>>, vector<1x1x8x128xf32>,
    %c2 = arith.constant 2 : index
    %c0_17 = arith.constant 0 : index
    %c0_18 = arith.constant 0 : index
    %c0_19 = arith.constant 0 : index
    %18 = vector.load %arg6[%c2, %c0_17, %c0_18, %c0_19] : memref<3x4x8x128xf32, #tpu.memory_space<vmem>>, vector<1x1x8x128xf32>
    %19 = vector.shape_cast %18 : vector<1x1x8x128xf32> to vector<8x128xf32>
    %20 = arith.addf %19, %5#8 : vector<8x128xf32>
    %c2_20 = arith.constant 2 : index
    %c0_21 = arith.constant 0 : index
    %c0_22 = arith.constant 0 : index
    %c0_23 = arith.constant 0 : index
    %21 = vector.load %arg6[%c2_20, %c0_21, %c0_22, %c0_23] : memref<3x4x8x128xf32, #tpu.memory_space<vmem>>, vector<1x1x8x128xf32>
    %22 = vector.shape_cast %21 : vector<1x1x8x128xf32> to vector<8x128xf32>
    %23 = vector.shape_cast %20 : vector<8x128xf32> to vector<1x1x8x128xf32>
    tpu.vector_store %arg6[%c2_20, %c0_21, %c0_22, %c0_23], %23 {strides = array<i32>} : memref<3x4x8x128xf32, #tpu.memory_space<vmem>>, vector<1x1x8x128xf32>,
    %c0_24 = arith.constant 0 : index
    %c1_25 = arith.constant 1 : index
    %c0_26 = arith.constant 0 : index
    %c0_27 = arith.constant 0 : index
    %24 = vector.load %arg6[%c0_24, %c1_25, %c0_26, %c0_27] : memref<3x4x8x128xf32, #tpu.memory_space<vmem>>, vector<1x1x8x128xf32>
    %25 = vector.shape_cast %24 : vector<1x1x8x128xf32> to vector<8x128xf32>
    %26 = arith.addf %25, %5#1 : vector<8x128xf32>
    %c0_28 = arith.constant 0 : index
    %c1_29 = arith.constant 1 : index
    %c0_30 = arith.constant 0 : index
    %c0_31 = arith.constant 0 : index
    %27 = vector.load %arg6[%c0_28, %c1_29, %c0_30, %c0_31] : memref<3x4x8x128xf32, #tpu.memory_space<vmem>>, vector<1x1x8x128xf32>
    %28 = vector.shape_cast %27 : vector<1x1x8x128xf32> to vector<8x128xf32>
    %29 = vector.shape_cast %26 : vector<8x128xf32> to vector<1x1x8x128xf32>
    tpu.vector_store %arg6[%c0_28, %c1_29, %c0_30, %c0_31], %29 {strides = array<i32>} : memref<3x4x8x128xf32, #tpu.memory_space<vmem>>, vector<1x1x8x128xf32>,
    %c1_32 = arith.constant 1 : index
    %c1_33 = arith.constant 1 : index
    %c0_34 = arith.constant 0 : index
    %c0_35 = arith.constant 0 : index
    %30 = vector.load %arg6[%c1_32, %c1_33, %c0_34, %c0_35] : memref<3x4x8x128xf32, #tpu.memory_space<vmem>>, vector<1x1x8x128xf32>
    %31 = vector.shape_cast %30 : vector<1x1x8x128xf32> to vector<8x128xf32>
    %32 = arith.addf %31, %5#5 : vector<8x128xf32>
    %c1_36 = arith.constant 1 : index
    %c1_37 = arith.constant 1 : index
    %c0_38 = arith.constant 0 : index
    %c0_39 = arith.constant 0 : index
    %33 = vector.load %arg6[%c1_36, %c1_37, %c0_38, %c0_39] : memref<3x4x8x128xf32, #tpu.memory_space<vmem>>, vector<1x1x8x128xf32>
    %34 = vector.shape_cast %33 : vector<1x1x8x128xf32> to vector<8x128xf32>
    %35 = vector.shape_cast %32 : vector<8x128xf32> to vector<1x1x8x128xf32>
    tpu.vector_store %arg6[%c1_36, %c1_37, %c0_38, %c0_39], %35 {strides = array<i32>} : memref<3x4x8x128xf32, #tpu.memory_space<vmem>>, vector<1x1x8x128xf32>,
    %c2_40 = arith.constant 2 : index
    %c1_41 = arith.constant 1 : index
    %c0_42 = arith.constant 0 : index
    %c0_43 = arith.constant 0 : index
    %36 = vector.load %arg6[%c2_40, %c1_41, %c0_42, %c0_43] : memref<3x4x8x128xf32, #tpu.memory_space<vmem>>, vector<1x1x8x128xf32>
    %37 = vector.shape_cast %36 : vector<1x1x8x128xf32> to vector<8x128xf32>
    %38 = arith.addf %37, %5#9 : vector<8x128xf32>
    %c2_44 = arith.constant 2 : index
    %c1_45 = arith.constant 1 : index
    %c0_46 = arith.constant 0 : index
    %c0_47 = arith.constant 0 : index
    %39 = vector.load %arg6[%c2_44, %c1_45, %c0_46, %c0_47] : memref<3x4x8x128xf32, #tpu.memory_space<vmem>>, vector<1x1x8x128xf32>
    %40 = vector.shape_cast %39 : vector<1x1x8x128xf32> to vector<8x128xf32>
    %41 = vector.shape_cast %38 : vector<8x128xf32> to vector<1x1x8x128xf32>
    tpu.vector_store %arg6[%c2_44, %c1_45, %c0_46, %c0_47], %41 {strides = array<i32>} : memref<3x4x8x128xf32, #tpu.memory_space<vmem>>, vector<1x1x8x128xf32>,
    %c0_48 = arith.constant 0 : index
    %c2_49 = arith.constant 2 : index
    %c0_50 = arith.constant 0 : index
    %c0_51 = arith.constant 0 : index
    %42 = vector.load %arg6[%c0_48, %c2_49, %c0_50, %c0_51] : memref<3x4x8x128xf32, #tpu.memory_space<vmem>>, vector<1x1x8x128xf32>
    %43 = vector.shape_cast %42 : vector<1x1x8x128xf32> to vector<8x128xf32>
    %44 = arith.addf %43, %5#2 : vector<8x128xf32>
    %c0_52 = arith.constant 0 : index
    %c2_53 = arith.constant 2 : index
    %c0_54 = arith.constant 0 : index
    %c0_55 = arith.constant 0 : index
    %45 = vector.load %arg6[%c0_52, %c2_53, %c0_54, %c0_55] : memref<3x4x8x128xf32, #tpu.memory_space<vmem>>, vector<1x1x8x128xf32>
    %46 = vector.shape_cast %45 : vector<1x1x8x128xf32> to vector<8x128xf32>
    %47 = vector.shape_cast %44 : vector<8x128xf32> to vector<1x1x8x128xf32>
    tpu.vector_store %arg6[%c0_52, %c2_53, %c0_54, %c0_55], %47 {strides = array<i32>} : memref<3x4x8x128xf32, #tpu.memory_space<vmem>>, vector<1x1x8x128xf32>,
    %c1_56 = arith.constant 1 : index
    %c2_57 = arith.constant 2 : index
    %c0_58 = arith.constant 0 : index
    %c0_59 = arith.constant 0 : index
    %48 = vector.load %arg6[%c1_56, %c2_57, %c0_58, %c0_59] : memref<3x4x8x128xf32, #tpu.memory_space<vmem>>, vector<1x1x8x128xf32>
    %49 = vector.shape_cast %48 : vector<1x1x8x128xf32> to vector<8x128xf32>
    %50 = arith.addf %49, %5#6 : vector<8x128xf32>
    %c1_60 = arith.constant 1 : index
    %c2_61 = arith.constant 2 : index
    %c0_62 = arith.constant 0 : index
    %c0_63 = arith.constant 0 : index
    %51 = vector.load %arg6[%c1_60, %c2_61, %c0_62, %c0_63] : memref<3x4x8x128xf32, #tpu.memory_space<vmem>>, vector<1x1x8x128xf32>
    %52 = vector.shape_cast %51 : vector<1x1x8x128xf32> to vector<8x128xf32>
    %53 = vector.shape_cast %50 : vector<8x128xf32> to vector<1x1x8x128xf32>
    tpu.vector_store %arg6[%c1_60, %c2_61, %c0_62, %c0_63], %53 {strides = array<i32>} : memref<3x4x8x128xf32, #tpu.memory_space<vmem>>, vector<1x1x8x128xf32>,
    %c2_64 = arith.constant 2 : index
    %c2_65 = arith.constant 2 : index
    %c0_66 = arith.constant 0 : index
    %c0_67 = arith.constant 0 : index
    %54 = vector.load %arg6[%c2_64, %c2_65, %c0_66, %c0_67] : memref<3x4x8x128xf32, #tpu.memory_space<vmem>>, vector<1x1x8x128xf32>
    %55 = vector.shape_cast %54 : vector<1x1x8x128xf32> to vector<8x128xf32>
    %56 = arith.addf %55, %5#10 : vector<8x128xf32>
    %c2_68 = arith.constant 2 : index
    %c2_69 = arith.constant 2 : index
    %c0_70 = arith.constant 0 : index
    %c0_71 = arith.constant 0 : index
    %57 = vector.load %arg6[%c2_68, %c2_69, %c0_70, %c0_71] : memref<3x4x8x128xf32, #tpu.memory_space<vmem>>, vector<1x1x8x128xf32>
    %58 = vector.shape_cast %57 : vector<1x1x8x128xf32> to vector<8x128xf32>
    %59 = vector.shape_cast %56 : vector<8x128xf32> to vector<1x1x8x128xf32>
    tpu.vector_store %arg6[%c2_68, %c2_69, %c0_70, %c0_71], %59 {strides = array<i32>} : memref<3x4x8x128xf32, #tpu.memory_space<vmem>>, vector<1x1x8x128xf32>,
    %c0_72 = arith.constant 0 : index
    %c3 = arith.constant 3 : index
    %c0_73 = arith.constant 0 : index
    %c0_74 = arith.constant 0 : index
    %60 = vector.load %arg6[%c0_72, %c3, %c0_73, %c0_74] : memref<3x4x8x128xf32, #tpu.memory_space<vmem>>, vector<1x1x8x128xf32>
    %61 = vector.shape_cast %60 : vector<1x1x8x128xf32> to vector<8x128xf32>
    %62 = arith.addf %61, %5#3 : vector<8x128xf32>
    %c0_75 = arith.constant 0 : index
    %c3_76 = arith.constant 3 : index
    %c0_77 = arith.constant 0 : index
    %c0_78 = arith.constant 0 : index
    %63 = vector.load %arg6[%c0_75, %c3_76, %c0_77, %c0_78] : memref<3x4x8x128xf32, #tpu.memory_space<vmem>>, vector<1x1x8x128xf32>
    %64 = vector.shape_cast %63 : vector<1x1x8x128xf32> to vector<8x128xf32>
    %65 = vector.shape_cast %62 : vector<8x128xf32> to vector<1x1x8x128xf32>
    tpu.vector_store %arg6[%c0_75, %c3_76, %c0_77, %c0_78], %65 {strides = array<i32>} : memref<3x4x8x128xf32, #tpu.memory_space<vmem>>, vector<1x1x8x128xf32>,
    %c1_79 = arith.constant 1 : index
    %c3_80 = arith.constant 3 : index
    %c0_81 = arith.constant 0 : index
    %c0_82 = arith.constant 0 : index
    %66 = vector.load %arg6[%c1_79, %c3_80, %c0_81, %c0_82] : memref<3x4x8x128xf32, #tpu.memory_space<vmem>>, vector<1x1x8x128xf32>
    %67 = vector.shape_cast %66 : vector<1x1x8x128xf32> to vector<8x128xf32>
    %68 = arith.addf %67, %5#7 : vector<8x128xf32>
    %c1_83 = arith.constant 1 : index
    %c3_84 = arith.constant 3 : index
    %c0_85 = arith.constant 0 : index
    %c0_86 = arith.constant 0 : index
    %69 = vector.load %arg6[%c1_83, %c3_84, %c0_85, %c0_86] : memref<3x4x8x128xf32, #tpu.memory_space<vmem>>, vector<1x1x8x128xf32>
    %70 = vector.shape_cast %69 : vector<1x1x8x128xf32> to vector<8x128xf32>
    %71 = vector.shape_cast %68 : vector<8x128xf32> to vector<1x1x8x128xf32>
    tpu.vector_store %arg6[%c1_83, %c3_84, %c0_85, %c0_86], %71 {strides = array<i32>} : memref<3x4x8x128xf32, #tpu.memory_space<vmem>>, vector<1x1x8x128xf32>,
    %c2_87 = arith.constant 2 : index
    %c3_88 = arith.constant 3 : index
    %c0_89 = arith.constant 0 : index
    %c0_90 = arith.constant 0 : index
    %72 = vector.load %arg6[%c2_87, %c3_88, %c0_89, %c0_90] : memref<3x4x8x128xf32, #tpu.memory_space<vmem>>, vector<1x1x8x128xf32>
    %73 = vector.shape_cast %72 : vector<1x1x8x128xf32> to vector<8x128xf32>
    %74 = arith.addf %73, %5#11 : vector<8x128xf32>
    %c2_91 = arith.constant 2 : index
    %c3_92 = arith.constant 3 : index
    %c0_93 = arith.constant 0 : index
    %c0_94 = arith.constant 0 : index
    %75 = vector.load %arg6[%c2_91, %c3_92, %c0_93, %c0_94] : memref<3x4x8x128xf32, #tpu.memory_space<vmem>>, vector<1x1x8x128xf32>
    %76 = vector.shape_cast %75 : vector<1x1x8x128xf32> to vector<8x128xf32>
    %77 = vector.shape_cast %74 : vector<8x128xf32> to vector<1x1x8x128xf32>
    tpu.vector_store %arg6[%c2_91, %c3_92, %c0_93, %c0_94], %77 {strides = array<i32>} : memref<3x4x8x128xf32, #tpu.memory_space<vmem>>, vector<1x1x8x128xf32>,
    %c0_i32_95 = arith.constant 0 : i32
    %78 = arith.cmpi eq, %arg2, %c0_i32_95 : i32
    %79 = arith.extui %78 : i1 to i32
    %c0_i32_96 = arith.constant 0 : i32
    %80 = arith.cmpi ne, %79, %c0_i32_96 : i32
    scf.if %80 {
      %c0_97 = arith.constant 0 : index
      %c0_98 = arith.constant 0 : index
      %c0_99 = arith.constant 0 : index
      %c0_100 = arith.constant 0 : index
      %81 = vector.load %arg6[%c0_97, %c0_98, %c0_99, %c0_100] : memref<3x4x8x128xf32, #tpu.memory_space<vmem>>, vector<3x4x8x128xf32>
      %cst_101 = arith.constant dense<0.000000e+00> : vector<3x4x8xf32>
      %82 = vector.multi_reduction <add>, %81, %cst_101 [3] : vector<3x4x8x128xf32> to vector<3x4x8xf32>
      %cst_102 = arith.constant dense<0.000000e+00> : vector<3x4xf32>
      %83 = vector.multi_reduction <add>, %82, %cst_102 [2] : vector<3x4x8xf32> to vector<3x4xf32>
      %c0_103 = arith.constant 0 : index
      %c0_104 = arith.constant 0 : index
      %c0_105 = arith.constant 0 : index
      %c0_106 = arith.constant 0 : index
      %84 = vector.load %arg5[%c0_103, %c0_104, %c0_105, %c0_106] : memref<1x1x3x4xf32, #tpu.memory_space<vmem>>, vector<1x1x3x4xf32>
      %85 = vector.shape_cast %84 : vector<1x1x3x4xf32> to vector<3x4xf32>
      %86 = vector.shape_cast %83 : vector<3x4xf32> to vector<1x1x3x4xf32>
      tpu.vector_store %arg5[%c0_103, %c0_104, %c0_105, %c0_106], %86 {strides = array<i32>} : memref<1x1x3x4xf32, #tpu.memory_space<vmem>>, vector<1x1x3x4xf32>,
    } else {
    }
    return
  }
  func.func @transform_0(%arg0: i32, %arg1: i32, %arg2: i32) -> (i32, i32, i32, i32) {
    %c1_i32 = arith.constant 1 : i32
    %0 = arith.muli %arg1, %c1_i32 : i32
    %1 = arith.addi %0, %arg2 : i32
    %c0_i32 = arith.constant 0 : i32
    %2 = arith.minsi %1, %c0_i32 : i32
    %c0_i32_0 = arith.constant 0 : i32
    %c0_i32_1 = arith.constant 0 : i32
    %c0_i32_2 = arith.constant 0 : i32
    return %arg0, %c0_i32_0, %2, %c0_i32_1 : i32, i32, i32, i32
  }
  func.func @transform_1(%arg0: i32, %arg1: i32, %arg2: i32) -> (i32, i32, i32, i32) {
    %c1_i32 = arith.constant 1 : i32
    %0 = arith.muli %arg1, %c1_i32 : i32
    %1 = arith.addi %0, %arg2 : i32
    %c0_i32 = arith.constant 0 : i32
    %2 = arith.minsi %1, %c0_i32 : i32
    %c0_i32_0 = arith.constant 0 : i32
    %c0_i32_1 = arith.constant 0 : i32
    %c0_i32_2 = arith.constant 0 : i32
    return %arg0, %c0_i32_0, %2, %c0_i32_1 : i32, i32, i32, i32
  }
  func.func @transform_2(%arg0: i32, %arg1: i32, %arg2: i32) -> (i32, i32, i32, i32) {
    %c0_i32 = arith.constant 0 : i32
    %c0_i32_0 = arith.constant 0 : i32
    %c0_i32_1 = arith.constant 0 : i32
    return %arg0, %arg1, %c0_i32, %c0_i32_0 : i32, i32, i32, i32
  }
}

</mosaic_0001>

<bundles_post_ra>
// kernel: tpu_custom_call.1
= control target key start
LH: loop header
LB: loop body
LE: loop exit
PB: predicated region body
PF: predicated region fallthrough
CT: control target
= control target key end

     0   :  { %7 = vsyncpa [#allocation4], 0  ;;  %s1483_s0 = inlined_call_operand.hbm [shape: f32[2,4,16,128], index: 0, kind: input, shape index: {}]   ;;  %s1484_s1 = inlined_call_operand.hbm [shape: s32[2,1,16,128], index: 1, kind: input, shape index: {}]   ;;  %s1485_s2 = inlined_call_operand.vmem [shape: f32[2,1,3,4], index: 2, kind: output, shape index: {}]  }
   0x1   :  { %9 = vsyncpa [#allocation4 + $0x1], 0 }
   0x2   :  { %10 = vsyncpa [#allocation6], 0 }
   0x3   :  { %12 = vsyncpa [#allocation6 + $0x1], 0  ;;  %s1172_s9 = smov 0   ;;  %s1174_s10 = smov 0  }
   0x4   :  { %s1176_s11 = smov 0   ;;  %s1178_s12 = smov 0  }
   0x5   :  { %s1180_s13 = smov 0   ;;  %s1182_s14 = smov 0  }
   0x6 LB: > { %s724_s15 = sadd.s32 4294967295, %s1097_s14   ;;  %s37_s16 = sadd.s32 1, %s1093_s13  ;;  %s1097_s14 = sphi %s1182_s14, %s18_s14   ;;  %s1093_s13 = sphi %s1180_s13, %s1513_s13   ;;  %s1089_s12 = sphi %s1178_s12, %s1512_s12   ;;  %s1085_s11 = sphi %s1176_s11, %s1511_s11   ;;  %s1081_s10 = sphi %s1174_s10, %s1510_s10   ;;  %s1077_s9 = sphi %s1172_s9, %s1509_s9  }
   0x7   : > { %p39_p0 = scmp.ge.s32.totalorder %s37_s16, 2  ;;  %s52_s17 = sadd.s32 1, %s1085_s11 }
   0x8   : > { %p59_p1 = scmp.ne.s32.totalorder %s1085_s11, %s1081_s10  ;;  %p60_p2 = scmp.eq.s32.totalorder %s1097_s14, 0 }
   0x9   : > { %s1515_s16 = smov (%p39_p0, %s37_s16), 0  ;;  %p65_p4 = scmp.ne.s32.totalorder %s1081_s10, %s1077_s9 }
   0xa   : > { %p1208_p3 = por %p60_p2, %p59_p1  ;;  %s47_s19 = ssub.s32 %s1093_s13, %s1515_s16 }
   0xb   : > { %p66_p5 = scmp.eq.s32.totalorder %s724_s15, 0  ;;  %p50_p6 = scmp.eq.s32.totalorder %s47_s19, 0 }
   0xc   : > { %p764_p8 = scmp.lt.s32.totalorder %s1097_s14, 2  ;;  %s1224_s22 = sand.u32 1, %s1085_s11  }
   0xd   : > { %p1215_p7 = por %p66_p5, %p65_p4  ;;  %s751_s23 = sshll.u32 %s1093_s13, 10 }
   0xe   : > { %s1221_s21 = scalar_select %p50_p6, %s1085_s11, %s52_s17  }
   0xf   : > { %s1488_s20 = scalar_select %p1215_p7, 1, 0 }
  0x10   : > { %s728_s24 = sshll.u32 %s1224_s22, 6  ;;  %s1231_s27 = scalar_lea.hbm %s1483_s0, %s751_s23 }
  0x11   : > { %s155_s28 = scalar_lea.vmem [#allocation3], %s728_s24  ;;  %p1235_p9 = pnand %p764_p8, %p1208_p3 }
  0x12   : > { %s167_s29 = sshll.u32 %s155_s28, 4  ;;  %s152_s3 = scalar_lea.sflag [#allocation4], %s1224_s22  ;;  %s1239_s29 = int_to_ptr.vmem [resolvable:$true] %s167_s29 }
  0x13   : > { %s931_s4 = scalar_lea.hbm %s1231_s27, 1024  ;;  %p933_p11 = pneg %p1235_p9 }
  0x14   : > { %p932_p10 = scmp.ne.s32.totalorder %s1231_s27, %s931_s4  ;;  %s936_s7 = scalar_lea.hbm %s1483_s0, 2048 }
  0x15   : > { %p937_p0 = scmp.lt.u32.totalorder %s1231_s27, %s1483_s0  ;;  %p938_p1 = scmp.lt.u32.totalorder %s936_s7, %s931_s4 }
  0x16   : > { %p934_p12 = pnand %p933_p11, %p932_p10  ;;  %p940_p3 = scmp.lt.u32.totalorder %s931_s4, %s1231_s27 }
  0x17   : > { %p939_p2 = por %p938_p1, %p937_p0 }
  0x18   : > { %p935_p13 = pneg %p934_p12 }
  0x19   : > { %p941_p4 = por %p940_p3, %p939_p2 }
  0x1b   : > { %p942_p5 = pnand %p941_p4, %p935_p13 }
  0x1d   : > { %945 = shalt.err (!%p942_p5)
}
  0x1e   : > { %s946_s15 = scalar_lea.vmem %s1239_s29, 1024  ;;  %s1151_s17 = smov [#allocation3]  }
  0x1f   : > { %p947_p6 = scmp.ne.s32.totalorder %s1239_s29, %s946_s15  ;;  %s951_s18 = sshll.u32 %s1151_s17, 4  ;;  %s952_s18 = int_to_ptr.vmem [resolvable:$false] %s951_s18 }
  0x20   : > { %s953_s19 = scalar_lea.vmem %s952_s18, 2048  ;;  %p954_p12 = scmp.lt.s32.totalorder %s1239_s29, %s952_s18 }
  0x21   : > { %p949_p8 = pnand %p947_p6, %p933_p11  ;;  %p955_p0 = scmp.lt.s32.totalorder %s953_s19, %s946_s15 }
  0x23   : > { %p950_p10 = pneg %p949_p8  ;;  %p956_p1 = por %p955_p0, %p954_p12 }
  0x25   : > { %p957_p2 = pnand %p956_p1, %p950_p10 }
  0x27   : > { %960 = shalt.err (!%p957_p2)
}
  0x28   : > { %s1152_s23 = smov 128   ;;  %s1153_s24 = smov 8  }
  0x29   : > { %760 = dma.hbm_to_vmem [thread:$0]  (!%p1235_p9), %s1231_s27, 1024, %s1239_s29, %s152_s3, %s1152_s23, %s1152_s23, %s1153_s24  }
  0x2a   : > { %p734_p13 = scmp.ge.s32.totalorder %s1097_s14, 1  ;;  %p201_p3 = scmp.lt.s32.totalorder %s1097_s14, 3 }
  0x2b   : > { %s731_s25 = sshll.u32 %s1224_s22, 4  ;;  %s752_s28 = sshll.u32 %s1093_s13, 8 }
  0x2c   : > { %p1275_p4 = pnand %p734_p13, %p201_p3  ;;  %s181_s4 = scalar_lea.vmem [#allocation5], %s731_s25 }
  0x2d   : > { %s193_s5 = sshll.u32 %s181_s4, 4  ;;  %s1283_s8 = scalar_lea.hbm %s1484_s1, %s752_s28  ;;  %s1285_s5 = int_to_ptr.vmem [resolvable:$true] %s193_s5 }
  0x2e   : > { %s178_s27 = scalar_lea.sflag [#allocation6], %s1224_s22  ;;  %s961_s29 = scalar_lea.hbm %s1283_s8, 256 }
  0x2f   : > { %p962_p5 = scmp.ne.s32.totalorder %s1283_s8, %s961_s29  ;;  %s966_s15 = scalar_lea.hbm %s1484_s1, 512 }
  0x30   : > { %p967_p10 = scmp.lt.u32.totalorder %s1283_s8, %s1484_s1  ;;  %p968_p12 = scmp.lt.u32.totalorder %s966_s15, %s961_s29 }
  0x31   : > { %p964_p6 = pnand %p962_p5, %p933_p11  ;;  %p970_p1 = scmp.lt.u32.totalorder %s961_s29, %s1283_s8 }
  0x32   : > { %p969_p0 = por %p968_p12, %p967_p10 }
  0x33   : > { %p965_p8 = pneg %p964_p6 }
  0x34   : > { %p971_p2 = por %p970_p1, %p969_p0 }
  0x36   : > { %p972_p13 = pnand %p971_p2, %p965_p8 }
  0x38   : > { %975 = shalt.err (!%p972_p13)
}
  0x39   : > { %s976_s19 = scalar_lea.vmem %s1285_s5, 256  ;;  %s1154_s25 = smov [#allocation5]  }
  0x3a   : > { %p977_p3 = scmp.ne.s32.totalorder %s1285_s5, %s976_s19  ;;  %s981_s28 = sshll.u32 %s1154_s25, 4  ;;  %s982_s28 = int_to_ptr.vmem [resolvable:$false] %s981_s28 }
  0x3b   : > { %s983_s4 = scalar_lea.vmem %s982_s28, 512  ;;  %p984_p7 = scmp.lt.s32.totalorder %s1285_s5, %s982_s28 }
  0x3c   : > { %p979_p5 = pnand %p977_p3, %p933_p11  ;;  %p985_p10 = scmp.lt.s32.totalorder %s983_s4, %s976_s19 }
  0x3e   : > { %p980_p6 = pneg %p979_p5  ;;  %p986_p12 = por %p985_p10, %p984_p7 }
  0x40   : > { %p987_p0 = pnand %p986_p12, %p980_p6 }
  0x42   : > { %990 = shalt.err (!%p987_p0)
}
  0x43   : > { %763 = dma.hbm_to_vmem [thread:$0]  (!%p1235_p9), %s1283_s8, 256, %s1285_s5, %s178_s27, %s1152_s23, %s1152_s23, %s1153_s24  }
  0x44   : > { %205 = sbr.rel (%p1275_p4) target bundleno = 450 (0x1c2), region = 28  ;;  %s207_s6 = sand.u32 (!%p1275_p4), 1, %s1081_s10  }
  0x45   : > { %s735_s7 = sshll.u32 (!%p1275_p4), %s207_s6, 6  ;;  %s208_s29 = scalar_lea.sflag (!%p1275_p4), [#allocation4], %s207_s6 }
  0x46   : > { %s1319_s3 = scalar_lea.vmem (!%p1275_p4), [#allocation3], %s735_s7  ;;  %p1491_p7 = scmp.ne.s32.totalorder (!%p1275_p4), %s1488_s20, 0 }
  0x4b   : > { %1068 = dma.done.wait (%p1491_p7), %s208_s29, 1024  }
  0x4c   : > { %1070 = vsyncadd (%p1491_p7), %s208_s29, 4294966272  ;;  %s736_s22 = sshll.u32 %s207_s6, 4  ;;  %s217_s30 = scalar_lea.sflag [#allocation6], %s207_s6 }
  0x4d   : > { %s1325_s9 = scalar_lea.vmem [#allocation5], %s736_s22 }
  0x4e   : > { %1072 = dma.done.wait (%p1491_p7), %s217_s30, 256  }
  0x4f   : > { %1074 = vsyncadd (%p1491_p7), %s217_s30, 4294967040  ;;  %p256_p9 = scmp.lt.s32.totalorder %s1089_s12, 1  ;;  %v1155_v0 = vmov 0.0   ;;  %v1340_v1 = vmov 0.0   ;;  %v1342_v2 = vmov 0.0   ;;  %v1344_v3 = vmov 0.0  }
  0x50   : > { %267 = vst [vmem:[#allocation2] sm:$0xff] %v1155_v0  ;;  %268 = vst [vmem:[#allocation2 + $0x8] sm:$0xff] %v1155_v0  ;;  %v1346_v4 = vmov 0.0   ;;  %v1348_v5 = vmov 0.0   ;;  %v1350_v6 = vmov 0.0   ;;  %v1352_v7 = vmov 0.0  }
  0x51   : > { %269 = vst [vmem:[#allocation2 + $0x10] sm:$0xff] %v1155_v0  ;;  %270 = vst [vmem:[#allocation2 + $0x18] sm:$0xff] %v1155_v0  ;;  %s1517_s12 = smov (!%p256_p9, %s1089_s12), 1  ;;  %v1354_v8 = vmov 0.0   ;;  %v1356_v9 = vmov 0.0   ;;  %v1358_v10 = vmov 0.0  }
  0x52   : > { %271 = vst [vmem:[#allocation2 + $0x20] sm:$0xff] %v1155_v0  ;;  %272 = vst [vmem:[#allocation2 + $0x28] sm:$0xff] %v1155_v0  ;;  %s737_s20 = sshll.u32 %s1517_s12, 2  ;;  %v1360_v11 = vmov 0.0   ;;  %v1362_v12 = vmov 0.0   ;;  %s1364_s12 = smov 0  }
  0x53   : > { %273 = vst [vmem:[#allocation2 + $0x30] sm:$0xff] %v1155_v0  ;;  %274 = vst [vmem:[#allocation2 + $0x38] sm:$0xff] %v1155_v0  ;;  %s1338_s26 = scalar_lea.vmem %s1485_s2, %s737_s20 }
  0x54   : > { %275 = vst [vmem:[#allocation2 + $0x40] sm:$0xff] %v1155_v0  ;;  %276 = vst [vmem:[#allocation2 + $0x48] sm:$0xff] %v1155_v0 }
  0x55   : > { %277 = vst [vmem:[#allocation2 + $0x50] sm:$0xff] %v1155_v0  ;;  %278 = vst [vmem:[#allocation2 + $0x58] sm:$0xff] %v1155_v0 }
  0x56 LB: >> { %s738_s5 = sshll.u32 %s1149_s12, 3  ;;  %v1156_v19 = vmov 0.0   ;;  %s284_s12 = sadd.s32 1, %s1149_s12   ;;  %s1149_s12 = sphi %s1364_s12, %s284_s12   ;;  %v1145_v12 = vphi %v1362_v12, %v1508_v12   ;;  %v1141_v11 = vphi %v1360_v11, %v1507_v11   ;;  %v1137_v10 = vphi %v1358_v10, %v1506_v10   ;;  %v1133_v9 = vphi %v1356_v9, %v1505_v9   ;;  %v1129_v8 = vphi %v1354_v8, %v1504_v8   ;;  %v1125_v7 = vphi %v1352_v7, %v1503_v7   ;;  %v1121_v6 = vphi %v1350_v6, %v1502_v6   ;;  %v1117_v5 = vphi %v1348_v5, %v1501_v5   ;;  %v1113_v4 = vphi %v1346_v4, %v1500_v4   ;;  %v1109_v3 = vphi %v1344_v3, %v1499_v3   ;;  %v1105_v2 = vphi %v1342_v2, %v1498_v2   ;;  %v1101_v1 = vphi %v1340_v1, %v1497_v1  }
  0x57   : >> { %s298_s8 = scalar_lea.vmem %s1319_s3, %s738_s5 [#allocation3]  ;;  %s328_s27 = scalar_lea.vmem %s1325_s9, %s738_s5 [#allocation5] }
  0x58   : >> { %v299_v13 = vld [vmem:[%s298_s8] sm:$0xff]  ;;  %v740_v14 = vld [vmem:[%s298_s8 + $0x10] sm:$0xff]  ;;  %p1410_p11 = scmp.ge.s32.totalorder %s284_s12, 2  }
  0x59   : >> { %v742_v15 = vld [vmem:[%s298_s8 + $0x20] sm:$0xff]  ;;  %v309_v17 = vmax.f32 %v299_v13, %v740_v14  ;;  %v744_v18 = vld [vmem:[%s298_s8 + $0x30] sm:$0xff]  ;;  %v378_v0 = vld [vmem:[#allocation2 + $0x28] sm:$0xff] (%p1410_p11)  ;;  %vm510_vm4 = vcmask (%p1410_p11), 1041409   ;;  %vm512_vm5 = vcmask (%p1410_p11), 1042434   ;;  %vm514_vm6 = vcmask (%p1410_p11), 1043459  }
  0x5a   : >> { %v329_v16 = vld [vmem:[%s328_s27] sm:$0xff]  ;;  %vm525_vm7 = vcmask (%p1410_p11), 60416   ;;  %vm553_vm8 = vcmask (%p1410_p11), 26624  }
  0x5b   : >> { %vm331_vm0 = vcmp.eq.s32.totalorder %v329_v16, 0  ;;  %vm339_vm1 = vcmp.eq.s32.totalorder %v329_v16, 1  ;;  %vm347_vm2 = vcmp.eq.s32.totalorder %v329_v16, 2  ;;  %vm355_vm3 = vcmp.eq.s32.totalorder %v329_v16, 3  ;;  %v366_v62 = vld [vmem:[#allocation2 + $0x20] sm:$0xff] (%p1410_p11)  ;;  %v390_v16 = vld [vmem:[#allocation2 + $0x30] sm:$0xff] (%p1410_p11) }
  0x5c   : >> { %v745_v20 = vsel %vm331_vm0, 1.0, %v1156_v19  ;;  %v746_v21 = vsel %vm339_vm1, 1.0, %v1156_v19  ;;  %v310_v22 = vmax.f32 %v309_v17, %v742_v15  ;;  %v747_v25 = vsel %vm347_vm2, 1.0, %v1156_v19  ;;  %v362_v63 = vld [vmem:[#allocation2] sm:$0xff] (%p1410_p11)  ;;  %v386_v17 = vld [vmem:[#allocation2 + $0x10] sm:$0xff] (%p1410_p11) }
  0x5d   : >> { %v1392_v4 = vadd.f32 %v1113_v4, %v745_v20   ;;  %v1394_v3 = vadd.f32 %v1109_v3, %v746_v21   ;;  %v1397_v2 = vadd.f32 %v1105_v2, %v747_v25   ;;  %v748_v27 = vsel %vm355_vm3, 1.0, %v1156_v19  ;;  %v382_v21 = vld [vmem:[#allocation2 + $0x48] sm:$0xff] (%p1410_p11)  ;;  %v402_v25 = vld [vmem:[#allocation2 + $0x38] sm:$0xff] (%p1410_p11) }
  0x5e   : >> { %v311_v28 = vmax.f32 %v310_v22, %v744_v18  ;;  %v1400_v1 = vadd.f32 %v1101_v1, %v748_v27   ;;  %v370_v22 = vld [vmem:[#allocation2 + $0x40] sm:$0xff] (%p1410_p11) }
  0x5f   : >> { %v1492_v23 = vmov %v1392_v4  ;;  %v1493_v24 = vmov %v1394_v3  ;;  %v1494_v26 = vmov %v1397_v2 }
  0x60   : >> { %v1495_v29 = vmov %v1400_v1  ;;  %v312_v30 = vsub.f32 %v299_v13, %v311_v28  ;;  %v315_v31 = vsub.f32 %v740_v14, %v311_v28  ;;  %v318_v32 = vsub.f32 %v742_v15, %v311_v28  ;;  %v374_v15 = vld [vmem:[#allocation2 + $0x8] sm:$0xff] (%p1410_p11) }
  0x61   : >> { %v321_v33 = vsub.f32 %v744_v18, %v311_v28  ;;  %v1497_v1 = vmov %v1495_v29  ;;  %v1498_v2 = vmov %v1494_v26  ;;  %v1499_v3 = vmov %v1493_v24 }
  0x62   : >> { %v313_v34 = vmul.f32 1.442695, %v312_v30  ;;  %v316_v35 = vmul.f32 1.442695, %v315_v31  ;;  %v319_v36 = vmul.f32 1.442695, %v318_v32  ;;  %v1500_v4 = vmov %v1492_v23 }
  0x63   : >> { %v322_v37 = vmul.f32 1.442695, %v321_v33  ;;  %v383_v1 = vadd.f32 (%p1410_p11), %v382_v21, %v1493_v24  ;;  %v371_v2 = vadd.f32 (%p1410_p11), %v370_v22, %v1492_v23  ;;  %v398_v4 = vld [vmem:[#allocation2 + $0x18] sm:$0xff] (%p1410_p11)  ;;  %v460_v23 = vlaneseq (%p1410_p11) }
  0x64   : >> { %921 = vpow2.f32 %v313_v34 }
  0x65   : >> { %923 = vpow2.f32 %v316_v35  ;;  %384 = vst [vmem:[#allocation2 + $0x48] sm:$0xff] (%p1410_p11), %v383_v1  ;;  %372 = vst [vmem:[#allocation2 + $0x40] sm:$0xff] (%p1410_p11), %v371_v2  ;;  %v461_v27 = vand.u32 (%p1410_p11), 127, %v460_v23  ;;  %v463_v28 = vshrl.u32 (%p1410_p11), %v460_v23, 7 }
  0x66   : >> { %925 = vpow2.f32 %v319_v36 }
  0x67   : >> { %927 = vpow2.f32 %v322_v37  ;;  %v464_v31 = vsub.s32 (%p1410_p11), %v461_v27, %v463_v28 }
  0x6e   : >> { %v922_v38 = vpop.eup %921 }
  0x6f   : >> { %v924_v39 = vpop.eup %923 }
  0x70   : >> { %v926_v40 = vpop.eup %925  ;;  %v324_v41 = vadd.f32 %v924_v39, %v922_v38 }
  0x71   : >> { %v928_v42 = vpop.eup %927 }
  0x72   : >> { %v325_v43 = vadd.f32 %v926_v40, %v324_v41 }
  0x74   : >> { %v326_v44 = vadd.f32 %v928_v42, %v325_v43 }
  0x76   : >> { %929 = vrcp.f32 %v326_v44 }
  0x80   : >> { %v930_v45 = vpop.eup %929 }
  0x81   : >> { %v330_v46 = vmul.f32 %v930_v45, %v922_v38  ;;  %v338_v47 = vmul.f32 %v930_v45, %v924_v39  ;;  %v346_v48 = vmul.f32 %v930_v45, %v926_v40  ;;  %v354_v49 = vmul.f32 %v930_v45, %v928_v42 }
  0x82   : > { %283 = sbr.rel (!%p1410_p11) target bundleno = 86 (0x56), region = 112 }
  0x83   : >> { %v332_v50 = vsel %vm331_vm0, %v330_v46, 0.0  ;;  %v334_v51 = vadd.f32 %v1129_v8, %v330_v46   ;;  %v340_v52 = vsel %vm339_vm1, %v338_v47, 0.0  ;;  %v342_v53 = vadd.f32 %v1125_v7, %v338_v47  }
  0x84   : >> { %v333_v54 = vadd.f32 %v1145_v12, %v332_v50   ;;  %v341_v55 = vadd.f32 %v1141_v11, %v340_v52   ;;  %v348_v56 = vsel %vm347_vm2, %v346_v48, 0.0  ;;  %v350_v57 = vadd.f32 %v1121_v6, %v346_v48  }
  0x85   : >> { %v349_v58 = vadd.f32 %v1137_v10, %v348_v56   ;;  %v356_v59 = vsel %vm355_vm3, %v354_v49, 0.0  ;;  %v358_v60 = vadd.f32 %v1117_v5, %v354_v49   ;;  %v1503_v7 = vmov %v342_v53 }
  0x86   : >> { %v357_v61 = vadd.f32 %v1133_v9, %v356_v59   ;;  %v1502_v6 = vmov %v350_v57  ;;  %v1504_v8 = vmov %v334_v51  ;;  %v1507_v11 = vmov %v341_v55 }
  0x87   : >> { %v1501_v5 = vmov %v358_v60  ;;  %v1506_v10 = vmov %v349_v58  ;;  %v1508_v12 = vmov %v333_v54  ;;  %v363_v13 = vadd.f32 (%p1410_p11), %v362_v63, %v333_v54  ;;  %v406_v6 = vld [vmem:[#allocation2 + $0x58] sm:$0xff] (%p1410_p11) }
  0x88   : >> { %v1505_v9 = vmov %v357_v61  ;;  %v367_v12 = vadd.f32 (%p1410_p11), %v366_v62, %v334_v51  ;;  %v379_v14 = vadd.f32 (%p1410_p11), %v378_v0, %v342_v53  ;;  %v375_v18 = vadd.f32 (%p1410_p11), %v374_v15, %v341_v55  ;;  %v394_v5 = vld [vmem:[#allocation2 + $0x50] sm:$0xff] (%p1410_p11) }
  0x89   : > { %v391_v19 = vadd.f32 %v390_v16, %v350_v57  ;;  %v387_v20 = vadd.f32 %v386_v17, %v349_v58  ;;  %364 = vst [vmem:[#allocation2] sm:$0xff] %v363_v13  ;;  %424 = vadd.xlane.f32.xlu0 %v363_v13  ;;  %v403_v3 = vadd.f32 %v402_v25, %v358_v60 }
  0x8a   : > { %368 = vst [vmem:[#allocation2 + $0x20] sm:$0xff] %v367_v12  ;;  %432 = vadd.xlane.f32.xlu1 %v367_v12  ;;  %380 = vst [vmem:[#allocation2 + $0x28] sm:$0xff] %v379_v14  ;;  %v399_v7 = vadd.f32 %v398_v4, %v357_v61  ;;  %v395_v8 = vadd.f32 %v394_v5, %v1494_v26  ;;  %v407_v9 = vadd.f32 %v406_v6, %v1495_v29 }
  0x8b   : > { %376 = vst [vmem:[#allocation2 + $0x8] sm:$0xff] %v375_v18  ;;  %392 = vst [vmem:[#allocation2 + $0x30] sm:$0xff] %v391_v19 }
  0x8c   : > { %388 = vst [vmem:[#allocation2 + $0x10] sm:$0xff] %v387_v20  ;;  %404 = vst [vmem:[#allocation2 + $0x38] sm:$0xff] %v403_v3 }
  0x8d   : > { %400 = vst [vmem:[#allocation2 + $0x18] sm:$0xff] %v399_v7  ;;  %396 = vst [vmem:[#allocation2 + $0x50] sm:$0xff] %v395_v8  ;;  %426 = vadd.xlane.f32.xlu0 %v375_v18 }
  0x8e   : > { %408 = vst [vmem:[#allocation2 + $0x58] sm:$0xff] %v407_v9  ;;  %434 = vadd.xlane.f32.xlu1 %v379_v14 }
  0x91   : > { %428 = vadd.xlane.f32.xlu0 %v387_v20 }
  0x92   : > { %436 = vadd.xlane.f32.xlu1 %v391_v19 }
  0x95   : > { %440 = vadd.xlane.f32.xlu0 %v371_v2 }
  0x96   : > { %442 = vadd.xlane.f32.xlu1 %v383_v1 }
  0x99   : > { %430 = vadd.xlane.f32.xlu0 %v399_v7 }
  0x9a   : > { %438 = vadd.xlane.f32.xlu1 %v403_v3 }
  0x9d   : > { %444 = vadd.xlane.f32.xlu0 %v395_v8 }
  0x9e   : > { %446 = vadd.xlane.f32.xlu1 %v407_v9 }
 0x116   : > { %v425_v11 = vpop.xlane.xlu0 %424 }
 0x117   : > { %v433_v10 = vpop.xlane.xlu1 %432  ;;  %v465_v39 = vrot.slane %v425_v11, %v464_v31 }
 0x118   : > { %v481_v38 = vrot.slane %v433_v10, %v464_v31 }
 0x11a   : > { %v427_v26 = vpop.xlane.xlu0 %426 }
 0x11b   : > { %v435_v24 = vpop.xlane.xlu1 %434  ;;  %v469_v35 = vrot.slane %v427_v26, %v464_v31 }
 0x11c   : > { %v485_v34 = vrot.slane %v435_v24, %v464_v31 }
 0x11d   : > { %v511_v43 = vsel %vm510_vm4, %v469_v35, %v465_v39 }
 0x11e   : > { %v429_v30 = vpop.xlane.xlu0 %428  ;;  %v516_v42 = vsel %vm510_vm4, %v485_v34, %v481_v38 }
 0x11f   : > { %v437_v29 = vpop.xlane.xlu1 %436  ;;  %v473_v37 = vrot.slane %v429_v30, %v464_v31 }
 0x120   : > { %v489_v36 = vrot.slane %v437_v29, %v464_v31 }
 0x121   : > { %v513_v49 = vsel %vm512_vm5, %v473_v37, %v511_v43 }
 0x122   : > { %v441_v33 = vpop.xlane.xlu0 %440  ;;  %v517_v48 = vsel %vm512_vm5, %v489_v36, %v516_v42 }
 0x123   : > { %v443_v32 = vpop.xlane.xlu1 %442  ;;  %v497_v47 = vrot.slane %v441_v33, %v464_v31 }
 0x124   : > { %v501_v46 = vrot.slane %v443_v32, %v464_v31 }
 0x126   : > { %v431_v41 = vpop.xlane.xlu0 %430  ;;  %v519_v58 = vsel %vm510_vm4, %v501_v46, %v497_v47 }
 0x127   : > { %v439_v40 = vpop.xlane.xlu1 %438  ;;  %v477_v45 = vrot.slane %v431_v41, %v464_v31 }
 0x128   : > { %v493_v44 = vrot.slane %v439_v40, %v464_v31 }
 0x129   : > { %v515_v51 = vsel %vm514_vm6, %v477_v45, %v513_v49 }
 0x12a   : > { %v518_v50 = vsel %vm514_vm6, %v493_v44, %v517_v48  ;;  %v445_v52 = vpop.xlane.xlu0 %444  ;;  %v526_v55 = vsel %vm525_vm7, %v515_v51, 0.0 }
 0x12b   : > { %v529_v53 = vsel %vm525_vm7, %v518_v50, 0.0  ;;  %v447_v54 = vpop.xlane.xlu1 %446  ;;  %v505_v56 = vrot.slane %v445_v52, %v464_v31  ;;  %527 = vadd.xlane.f32.xlu0 %v526_v55 }
 0x12c   : > { %530 = vadd.xlane.f32.xlu1 %v529_v53  ;;  %v509_v57 = vrot.slane %v447_v54, %v464_v31 }
 0x12d   : > { %v520_v59 = vsel %vm512_vm5, %v505_v56, %v519_v58 }
 0x12e   : > { %v521_v60 = vsel %vm514_vm6, %v509_v57, %v520_v59 }
 0x12f   : > { %v532_v61 = vsel %vm525_vm7, %v521_v60, 0.0 }
 0x130   : > { %533 = vadd.xlane.f32.xlu0 %v532_v61 }
 0x1b8   : > { %v528_v63 = vpop.xlane.xlu0 %527 }
 0x1b9   : > { %v531_v62 = vpop.xlane.xlu1 %530  ;;  %v541_v12 = vrot.slane %v528_v63, %v464_v31 }
 0x1ba   : > { %v545_v0 = vrot.slane %v531_v62, %v464_v31 }
 0x1bc   : > { %v550_v15 = vsel %vm510_vm4, %v545_v0, %v541_v12 }
 0x1bd   : > { %v534_v13 = vpop.xlane.xlu0 %533 }
 0x1be   : > { %v549_v14 = vrot.slane %v534_v13, %v464_v31 }
 0x1c0   : > { %v551_v16 = vsel %vm512_vm5, %v549_v14, %v550_v15 }
 0x1c1   : > { %554 = vst.msk [vmem:[%s1338_s26] sm:$0x7] %vm553_vm8, %v551_v16 }
 0x1c2 PF: > { %s18_s14 = sadd.s32 1, %s1097_s14   ;;  %s1509_s9 = smov %s1081_s10 }
 0x1c3   : > { %p15_p4 = scmp.ge.s32.totalorder %s18_s14, 4   ;;  %s1510_s10 = smov %s1085_s11 }
 0x1c4   : > { %s1511_s11 = smov %s1221_s21  ;;  %s1512_s12 = smov %s1093_s13 }
 0x1c5   : > { %s1513_s13 = smov %s1515_s16  ;;  %17 = sbr.rel (!%p15_p4) target bundleno = 6 (0x6), region = 123 }
 0x1cc   :  { %580 = vsyncpa [#allocation4], 1 }
 0x1cd   :  { %582 = vsyncpa [#allocation4 + $0x1], 1 }
 0x1ce   :  { %583 = vsyncpa [#allocation6], 1 }
 0x1cf   :  { %585 = vsyncpa [#allocation6 + $0x1], 1 }

</bundles_post_ra>
